<compile_context>
chip_gen: v7x
topology: tpu7x:2x2x1
jax: 0.10.0
libtpu: 0.0.40
codegen_flags: <defaults>
</compile_context>

<pallas_src>
import functools

import jax
import jax.numpy as jnp
from jax.experimental import pallas as pl
from jax.experimental.pallas import tpu as pltpu

NEG_SLOPE = 0.01  # nn.LeakyReLU default negative_slope


def _cdiv(a, b):
    return (a + b - 1) // b


def _round_up(a, b):
    return _cdiv(a, b) * b


def _conv1x1_vpu_kernel(cin, cout, w_ref, b_ref, x_ref, o_ref):
    """Tiny-channel path: VPU broadcast-FMAs, weight/bias scalars in SMEM.

    w_ref: (Cout, Cin) SMEM   b_ref: (Cout,) SMEM
    x_ref: (1, Cin, ts) VMEM  o_ref: (1, Cout, ts) VMEM
    """
    x = x_ref[0].astype(jnp.float32)          # (Cin, ts), lane-dense
    rows = []
    for o in range(cout):                     # unrolled: cout*cin scalar FMAs
        acc = w_ref[o, 0] * x[0:1, :]
        for c in range(1, cin):
            acc = acc + w_ref[o, c] * x[c:c + 1, :]
        acc = acc + b_ref[o]
        rows.append(acc)
    y = jnp.concatenate(rows, axis=0)         # (Cout, ts)
    y = jnp.where(y >= 0.0, y, NEG_SLOPE * y)  # LeakyReLU
    o_ref[0] = y.astype(o_ref.dtype)          # single dense store


def _conv1x1_mxu_kernel(w_ref, b_ref, x_ref, o_ref):
    """Large-channel path: MXU matmul, weight resident in VMEM.

    w_ref: (Cout, Cin) VMEM   b_ref: (Cout, 1) VMEM
    x_ref: (1, Cin, ts) VMEM  o_ref: (1, Cout, ts) VMEM
    """
    y = jnp.dot(w_ref[...], x_ref[0], preferred_element_type=jnp.float32)
    y = y + b_ref[...]
    y = jnp.where(y >= 0.0, y, NEG_SLOPE * y)
    o_ref[0] = y.astype(o_ref.dtype)


def conv_bn_layer_forward(x_nchw, weight, bias, *, ts_target=2048):
    """ConvBNLayer.forward: 1x1 conv (with bias) + LeakyReLU.

    x_nchw : (N, Cin, H, W)
    weight : (Cout, Cin, 1, 1)   (PyTorch Conv2d layout)
    bias   : (Cout,)
    returns: (N, Cout, H, W)
    Works for f32 or bf16 activations (accumulation is always f32).
    """
    N, Cin, H, W = x_nchw.shape
    Cout = weight.shape[0]
    S = H * W
    dtype = x_nchw.dtype
    itemsize = jnp.dtype(dtype).itemsize

    # Free reshape to spatial-last (no transpose, no extra HBM traffic).
    x_sp = x_nchw.reshape(N, Cin, S)
    wm = weight.reshape(Cout, Cin)

    # Pick a lane-dense spatial tile: multiple of 128, as large as useful.
    ts = min(ts_target, _round_up(S, 128))
    # Keep >= 2 grid steps when possible so both v7x TensorCores get work.
    if N * _cdiv(S, ts) < 2 and S > 128:
        ts = _round_up(_cdiv(S, 2), 128)
    n_s = _cdiv(S, ts)
    S_pad = n_s * ts
    if S_pad != S:
        # Ragged tail: pad spatial axis; padded columns are sliced off below.
        x_sp = jnp.pad(x_sp, ((0, 0), (0, 0), (0, S_pad - S)))

    # Explicit VMEM budget (double-buffered input + output tiles + headroom),
    # valid on v5e (16 MiB scoped default) / v6e (32 MiB) / v7x (32/64 MiB).
    tile_bytes = 2 * (Cin + Cout) * ts * itemsize
    vmem_limit = int(max(4 << 20, min(32 << 20, 8 * tile_bytes)))

    cost = pl.CostEstimate(
        flops=2 * N * S * Cin * Cout,
        transcendentals=0,
        bytes_accessed=N * S * (Cin + Cout) * itemsize + (Cin * Cout + Cout) * 4,
    )
    cparams = pltpu.CompilerParams(
        dimension_semantics=("parallel", "parallel"),
        vmem_limit_bytes=vmem_limit,
    )

    use_vpu = (Cin < 64) or (Cout < 64)
    if use_vpu:
        kernel = functools.partial(_conv1x1_vpu_kernel, Cin, Cout)
        in_specs = [
            pl.BlockSpec(memory_space=pltpu.MemorySpace.SMEM),        # weight
            pl.BlockSpec(memory_space=pltpu.MemorySpace.SMEM),        # bias
            pl.BlockSpec((1, Cin, ts), lambda n, s: (n, 0, s)),       # x tile
        ]
        args = (wm.astype(jnp.float32), bias.astype(jnp.float32), x_sp)
    else:
        kernel = _conv1x1_mxu_kernel
        in_specs = [
            pl.BlockSpec((Cout, Cin), lambda n, s: (0, 0)),           # weight
            pl.BlockSpec((Cout, 1), lambda n, s: (0, 0)),             # bias
            pl.BlockSpec((1, Cin, ts), lambda n, s: (n, 0, s)),       # x tile
        ]
        args = (wm, bias.reshape(Cout, 1).astype(jnp.float32), x_sp)

    out_sp = pl.pallas_call(
        kernel,
        out_shape=jax.ShapeDtypeStruct((N, Cout, S_pad), dtype),
        grid_spec=pltpu.PrefetchScalarGridSpec(
            num_scalar_prefetch=0,
            grid=(N, n_s),
            in_specs=in_specs,
            out_specs=pl.BlockSpec((1, Cout, ts), lambda n, s: (n, 0, s)),
        ),
        compiler_params=cparams,
        cost_estimate=cost,
    )(*args)

    if S_pad != S:
        out_sp = out_sp[:, :, :S]
    # Free reshape back to NCHW.
    return out_sp.reshape(N, Cout, H, W)


def _reference(x_nchw, weight, bias):
    # pure-JAX reference of conv1x1 + LeakyReLU for sanity check
    y = jnp.einsum("nchw,oc->nohw", x_nchw,
                   weight.reshape(weight.shape[0], -1))
    y = y + bias[None, :, None, None]
    return jnp.where(y >= 0, y, NEG_SLOPE * y)


if __name__ == "__main__":
    key = jax.random.PRNGKey(0)
    kx, kw = jax.random.split(key)

    N, Cin, Cout, Hs, Ws = 2, 4, 8, 16, 16

    x = jax.random.normal(kx, (N, Cin, Hs, Ws), dtype=jnp.float32)
    # conv1x1 init: weight ~ N(0, 0.01), bias = 0 (deterministic via PRNGKey)
    weight = 0.01 * jax.random.normal(kw, (Cout, Cin, 1, 1), dtype=jnp.float32)
    bias = jnp.zeros((Cout,), dtype=jnp.float32)

    out = conv_bn_layer_forward(x, weight, bias)
    out = jax.block_until_ready(out)

    ref = _reference(x, weight, bias)
    assert out.shape == (N, Cout, Hs, Ws)
    assert jnp.allclose(out, ref, atol=1e-5, rtol=1e-5)

    print("KERNEL_OK")
</pallas_src>

<mosaic_0001>
module attributes {stable_mosaic.version = 11 : i64} {
  func.func @_conv1x1_vpu_kernel(%arg0: i32, %arg1: i32, %arg2: memref<8x4xf32, #tpu.memory_space<smem>>, %arg3: memref<8xf32, #tpu.memory_space<smem>>, %arg4: memref<1x4x256xf32, #tpu.memory_space<vmem>>, %arg5: memref<1x8x256xf32, #tpu.memory_space<vmem>>) attributes {dimension_semantics = [#tpu.dimension_semantics<parallel>, #tpu.dimension_semantics<parallel>], iteration_bounds = array<i64: 2, 1>, scalar_prefetch = 0 : i64, scratch_operands = 0 : i64, tpu.core_type = #tpu.core_type<tc>, window_params = [{transform_indices = @transform_0, window_bounds = array<i64: 8, 4>}, {transform_indices = @transform_1, window_bounds = array<i64: 8>}, {transform_indices = @transform_2, window_bounds = array<i64: 1, 4, 256>}, {transform_indices = @transform_3, window_bounds = array<i64: 1, 8, 256>}]} {
    %c0 = arith.constant 0 : index
    %c0_0 = arith.constant 0 : index
    %c0_1 = arith.constant 0 : index
    %0 = vector.load %arg4[%c0, %c0_0, %c0_1] : memref<1x4x256xf32, #tpu.memory_space<vmem>>, vector<1x4x256xf32>
    %1 = vector.shape_cast %0 : vector<1x4x256xf32> to vector<4x256xf32>
    %c0_2 = arith.constant 0 : index
    %c0_3 = arith.constant 0 : index
    %2 = memref.load %arg2[%c0_2, %c0_3] : memref<8x4xf32, #tpu.memory_space<smem>>
    %3 = vector.extract_strided_slice %1 {offsets = [0, 0], sizes = [1, 256], strides = [1, 1]} : vector<4x256xf32> to vector<1x256xf32>
    %4 = vector.broadcast %2 : f32 to vector<1x256xf32>
    %5 = arith.mulf %4, %3 : vector<1x256xf32>
    %c0_4 = arith.constant 0 : index
    %c1 = arith.constant 1 : index
    %6 = memref.load %arg2[%c0_4, %c1] : memref<8x4xf32, #tpu.memory_space<smem>>
    %7 = vector.extract_strided_slice %1 {offsets = [1, 0], sizes = [1, 256], strides = [1, 1]} : vector<4x256xf32> to vector<1x256xf32>
    %8 = vector.broadcast %6 : f32 to vector<1x256xf32>
    %9 = arith.mulf %8, %7 : vector<1x256xf32>
    %10 = arith.addf %5, %9 : vector<1x256xf32>
    %c0_5 = arith.constant 0 : index
    %c2 = arith.constant 2 : index
    %11 = memref.load %arg2[%c0_5, %c2] : memref<8x4xf32, #tpu.memory_space<smem>>
    %12 = vector.extract_strided_slice %1 {offsets = [2, 0], sizes = [1, 256], strides = [1, 1]} : vector<4x256xf32> to vector<1x256xf32>
    %13 = vector.broadcast %11 : f32 to vector<1x256xf32>
    %14 = arith.mulf %13, %12 : vector<1x256xf32>
    %15 = arith.addf %10, %14 : vector<1x256xf32>
    %c0_6 = arith.constant 0 : index
    %c3 = arith.constant 3 : index
    %16 = memref.load %arg2[%c0_6, %c3] : memref<8x4xf32, #tpu.memory_space<smem>>
    %17 = vector.extract_strided_slice %1 {offsets = [3, 0], sizes = [1, 256], strides = [1, 1]} : vector<4x256xf32> to vector<1x256xf32>
    %18 = vector.broadcast %16 : f32 to vector<1x256xf32>
    %19 = arith.mulf %18, %17 : vector<1x256xf32>
    %20 = arith.addf %15, %19 : vector<1x256xf32>
    %c0_7 = arith.constant 0 : index
    %21 = memref.load %arg3[%c0_7] : memref<8xf32, #tpu.memory_space<smem>>
    %22 = vector.broadcast %21 : f32 to vector<1x256xf32>
    %23 = arith.addf %20, %22 : vector<1x256xf32>
    %c1_8 = arith.constant 1 : index
    %c0_9 = arith.constant 0 : index
    %24 = memref.load %arg2[%c1_8, %c0_9] : memref<8x4xf32, #tpu.memory_space<smem>>
    %25 = vector.extract_strided_slice %1 {offsets = [0, 0], sizes = [1, 256], strides = [1, 1]} : vector<4x256xf32> to vector<1x256xf32>
    %26 = vector.broadcast %24 : f32 to vector<1x256xf32>
    %27 = arith.mulf %26, %25 : vector<1x256xf32>
    %c1_10 = arith.constant 1 : index
    %c1_11 = arith.constant 1 : index
    %28 = memref.load %arg2[%c1_10, %c1_11] : memref<8x4xf32, #tpu.memory_space<smem>>
    %29 = vector.extract_strided_slice %1 {offsets = [1, 0], sizes = [1, 256], strides = [1, 1]} : vector<4x256xf32> to vector<1x256xf32>
    %30 = vector.broadcast %28 : f32 to vector<1x256xf32>
    %31 = arith.mulf %30, %29 : vector<1x256xf32>
    %32 = arith.addf %27, %31 : vector<1x256xf32>
    %c1_12 = arith.constant 1 : index
    %c2_13 = arith.constant 2 : index
    %33 = memref.load %arg2[%c1_12, %c2_13] : memref<8x4xf32, #tpu.memory_space<smem>>
    %34 = vector.extract_strided_slice %1 {offsets = [2, 0], sizes = [1, 256], strides = [1, 1]} : vector<4x256xf32> to vector<1x256xf32>
    %35 = vector.broadcast %33 : f32 to vector<1x256xf32>
    %36 = arith.mulf %35, %34 : vector<1x256xf32>
    %37 = arith.addf %32, %36 : vector<1x256xf32>
    %c1_14 = arith.constant 1 : index
    %c3_15 = arith.constant 3 : index
    %38 = memref.load %arg2[%c1_14, %c3_15] : memref<8x4xf32, #tpu.memory_space<smem>>
    %39 = vector.extract_strided_slice %1 {offsets = [3, 0], sizes = [1, 256], strides = [1, 1]} : vector<4x256xf32> to vector<1x256xf32>
    %40 = vector.broadcast %38 : f32 to vector<1x256xf32>
    %41 = arith.mulf %40, %39 : vector<1x256xf32>
    %42 = arith.addf %37, %41 : vector<1x256xf32>
    %c1_16 = arith.constant 1 : index
    %43 = memref.load %arg3[%c1_16] : memref<8xf32, #tpu.memory_space<smem>>
    %44 = vector.broadcast %43 : f32 to vector<1x256xf32>
    %45 = arith.addf %42, %44 : vector<1x256xf32>
    %c2_17 = arith.constant 2 : index
    %c0_18 = arith.constant 0 : index
    %46 = memref.load %arg2[%c2_17, %c0_18] : memref<8x4xf32, #tpu.memory_space<smem>>
    %47 = vector.extract_strided_slice %1 {offsets = [0, 0], sizes = [1, 256], strides = [1, 1]} : vector<4x256xf32> to vector<1x256xf32>
    %48 = vector.broadcast %46 : f32 to vector<1x256xf32>
    %49 = arith.mulf %48, %47 : vector<1x256xf32>
    %c2_19 = arith.constant 2 : index
    %c1_20 = arith.constant 1 : index
    %50 = memref.load %arg2[%c2_19, %c1_20] : memref<8x4xf32, #tpu.memory_space<smem>>
    %51 = vector.extract_strided_slice %1 {offsets = [1, 0], sizes = [1, 256], strides = [1, 1]} : vector<4x256xf32> to vector<1x256xf32>
    %52 = vector.broadcast %50 : f32 to vector<1x256xf32>
    %53 = arith.mulf %52, %51 : vector<1x256xf32>
    %54 = arith.addf %49, %53 : vector<1x256xf32>
    %c2_21 = arith.constant 2 : index
    %c2_22 = arith.constant 2 : index
    %55 = memref.load %arg2[%c2_21, %c2_22] : memref<8x4xf32, #tpu.memory_space<smem>>
    %56 = vector.extract_strided_slice %1 {offsets = [2, 0], sizes = [1, 256], strides = [1, 1]} : vector<4x256xf32> to vector<1x256xf32>
    %57 = vector.broadcast %55 : f32 to vector<1x256xf32>
    %58 = arith.mulf %57, %56 : vector<1x256xf32>
    %59 = arith.addf %54, %58 : vector<1x256xf32>
    %c2_23 = arith.constant 2 : index
    %c3_24 = arith.constant 3 : index
    %60 = memref.load %arg2[%c2_23, %c3_24] : memref<8x4xf32, #tpu.memory_space<smem>>
    %61 = vector.extract_strided_slice %1 {offsets = [3, 0], sizes = [1, 256], strides = [1, 1]} : vector<4x256xf32> to vector<1x256xf32>
    %62 = vector.broadcast %60 : f32 to vector<1x256xf32>
    %63 = arith.mulf %62, %61 : vector<1x256xf32>
    %64 = arith.addf %59, %63 : vector<1x256xf32>
    %c2_25 = arith.constant 2 : index
    %65 = memref.load %arg3[%c2_25] : memref<8xf32, #tpu.memory_space<smem>>
    %66 = vector.broadcast %65 : f32 to vector<1x256xf32>
    %67 = arith.addf %64, %66 : vector<1x256xf32>
    %c3_26 = arith.constant 3 : index
    %c0_27 = arith.constant 0 : index
    %68 = memref.load %arg2[%c3_26, %c0_27] : memref<8x4xf32, #tpu.memory_space<smem>>
    %69 = vector.extract_strided_slice %1 {offsets = [0, 0], sizes = [1, 256], strides = [1, 1]} : vector<4x256xf32> to vector<1x256xf32>
    %70 = vector.broadcast %68 : f32 to vector<1x256xf32>
    %71 = arith.mulf %70, %69 : vector<1x256xf32>
    %c3_28 = arith.constant 3 : index
    %c1_29 = arith.constant 1 : index
    %72 = memref.load %arg2[%c3_28, %c1_29] : memref<8x4xf32, #tpu.memory_space<smem>>
    %73 = vector.extract_strided_slice %1 {offsets = [1, 0], sizes = [1, 256], strides = [1, 1]} : vector<4x256xf32> to vector<1x256xf32>
    %74 = vector.broadcast %72 : f32 to vector<1x256xf32>
    %75 = arith.mulf %74, %73 : vector<1x256xf32>
    %76 = arith.addf %71, %75 : vector<1x256xf32>
    %c3_30 = arith.constant 3 : index
    %c2_31 = arith.constant 2 : index
    %77 = memref.load %arg2[%c3_30, %c2_31] : memref<8x4xf32, #tpu.memory_space<smem>>
    %78 = vector.extract_strided_slice %1 {offsets = [2, 0], sizes = [1, 256], strides = [1, 1]} : vector<4x256xf32> to vector<1x256xf32>
    %79 = vector.broadcast %77 : f32 to vector<1x256xf32>
    %80 = arith.mulf %79, %78 : vector<1x256xf32>
    %81 = arith.addf %76, %80 : vector<1x256xf32>
    %c3_32 = arith.constant 3 : index
    %c3_33 = arith.constant 3 : index
    %82 = memref.load %arg2[%c3_32, %c3_33] : memref<8x4xf32, #tpu.memory_space<smem>>
    %83 = vector.extract_strided_slice %1 {offsets = [3, 0], sizes = [1, 256], strides = [1, 1]} : vector<4x256xf32> to vector<1x256xf32>
    %84 = vector.broadcast %82 : f32 to vector<1x256xf32>
    %85 = arith.mulf %84, %83 : vector<1x256xf32>
    %86 = arith.addf %81, %85 : vector<1x256xf32>
    %c3_34 = arith.constant 3 : index
    %87 = memref.load %arg3[%c3_34] : memref<8xf32, #tpu.memory_space<smem>>
    %88 = vector.broadcast %87 : f32 to vector<1x256xf32>
    %89 = arith.addf %86, %88 : vector<1x256xf32>
    %c4 = arith.constant 4 : index
    %c0_35 = arith.constant 0 : index
    %90 = memref.load %arg2[%c4, %c0_35] : memref<8x4xf32, #tpu.memory_space<smem>>
    %91 = vector.extract_strided_slice %1 {offsets = [0, 0], sizes = [1, 256], strides = [1, 1]} : vector<4x256xf32> to vector<1x256xf32>
    %92 = vector.broadcast %90 : f32 to vector<1x256xf32>
    %93 = arith.mulf %92, %91 : vector<1x256xf32>
    %c4_36 = arith.constant 4 : index
    %c1_37 = arith.constant 1 : index
    %94 = memref.load %arg2[%c4_36, %c1_37] : memref<8x4xf32, #tpu.memory_space<smem>>
    %95 = vector.extract_strided_slice %1 {offsets = [1, 0], sizes = [1, 256], strides = [1, 1]} : vector<4x256xf32> to vector<1x256xf32>
    %96 = vector.broadcast %94 : f32 to vector<1x256xf32>
    %97 = arith.mulf %96, %95 : vector<1x256xf32>
    %98 = arith.addf %93, %97 : vector<1x256xf32>
    %c4_38 = arith.constant 4 : index
    %c2_39 = arith.constant 2 : index
    %99 = memref.load %arg2[%c4_38, %c2_39] : memref<8x4xf32, #tpu.memory_space<smem>>
    %100 = vector.extract_strided_slice %1 {offsets = [2, 0], sizes = [1, 256], strides = [1, 1]} : vector<4x256xf32> to vector<1x256xf32>
    %101 = vector.broadcast %99 : f32 to vector<1x256xf32>
    %102 = arith.mulf %101, %100 : vector<1x256xf32>
    %103 = arith.addf %98, %102 : vector<1x256xf32>
    %c4_40 = arith.constant 4 : index
    %c3_41 = arith.constant 3 : index
    %104 = memref.load %arg2[%c4_40, %c3_41] : memref<8x4xf32, #tpu.memory_space<smem>>
    %105 = vector.extract_strided_slice %1 {offsets = [3, 0], sizes = [1, 256], strides = [1, 1]} : vector<4x256xf32> to vector<1x256xf32>
    %106 = vector.broadcast %104 : f32 to vector<1x256xf32>
    %107 = arith.mulf %106, %105 : vector<1x256xf32>
    %108 = arith.addf %103, %107 : vector<1x256xf32>
    %c4_42 = arith.constant 4 : index
    %109 = memref.load %arg3[%c4_42] : memref<8xf32, #tpu.memory_space<smem>>
    %110 = vector.broadcast %109 : f32 to vector<1x256xf32>
    %111 = arith.addf %108, %110 : vector<1x256xf32>
    %c5 = arith.constant 5 : index
    %c0_43 = arith.constant 0 : index
    %112 = memref.load %arg2[%c5, %c0_43] : memref<8x4xf32, #tpu.memory_space<smem>>
    %113 = vector.extract_strided_slice %1 {offsets = [0, 0], sizes = [1, 256], strides = [1, 1]} : vector<4x256xf32> to vector<1x256xf32>
    %114 = vector.broadcast %112 : f32 to vector<1x256xf32>
    %115 = arith.mulf %114, %113 : vector<1x256xf32>
    %c5_44 = arith.constant 5 : index
    %c1_45 = arith.constant 1 : index
    %116 = memref.load %arg2[%c5_44, %c1_45] : memref<8x4xf32, #tpu.memory_space<smem>>
    %117 = vector.extract_strided_slice %1 {offsets = [1, 0], sizes = [1, 256], strides = [1, 1]} : vector<4x256xf32> to vector<1x256xf32>
    %118 = vector.broadcast %116 : f32 to vector<1x256xf32>
    %119 = arith.mulf %118, %117 : vector<1x256xf32>
    %120 = arith.addf %115, %119 : vector<1x256xf32>
    %c5_46 = arith.constant 5 : index
    %c2_47 = arith.constant 2 : index
    %121 = memref.load %arg2[%c5_46, %c2_47] : memref<8x4xf32, #tpu.memory_space<smem>>
    %122 = vector.extract_strided_slice %1 {offsets = [2, 0], sizes = [1, 256], strides = [1, 1]} : vector<4x256xf32> to vector<1x256xf32>
    %123 = vector.broadcast %121 : f32 to vector<1x256xf32>
    %124 = arith.mulf %123, %122 : vector<1x256xf32>
    %125 = arith.addf %120, %124 : vector<1x256xf32>
    %c5_48 = arith.constant 5 : index
    %c3_49 = arith.constant 3 : index
    %126 = memref.load %arg2[%c5_48, %c3_49] : memref<8x4xf32, #tpu.memory_space<smem>>
    %127 = vector.extract_strided_slice %1 {offsets = [3, 0], sizes = [1, 256], strides = [1, 1]} : vector<4x256xf32> to vector<1x256xf32>
    %128 = vector.broadcast %126 : f32 to vector<1x256xf32>
    %129 = arith.mulf %128, %127 : vector<1x256xf32>
    %130 = arith.addf %125, %129 : vector<1x256xf32>
    %c5_50 = arith.constant 5 : index
    %131 = memref.load %arg3[%c5_50] : memref<8xf32, #tpu.memory_space<smem>>
    %132 = vector.broadcast %131 : f32 to vector<1x256xf32>
    %133 = arith.addf %130, %132 : vector<1x256xf32>
    %c6 = arith.constant 6 : index
    %c0_51 = arith.constant 0 : index
    %134 = memref.load %arg2[%c6, %c0_51] : memref<8x4xf32, #tpu.memory_space<smem>>
    %135 = vector.extract_strided_slice %1 {offsets = [0, 0], sizes = [1, 256], strides = [1, 1]} : vector<4x256xf32> to vector<1x256xf32>
    %136 = vector.broadcast %134 : f32 to vector<1x256xf32>
    %137 = arith.mulf %136, %135 : vector<1x256xf32>
    %c6_52 = arith.constant 6 : index
    %c1_53 = arith.constant 1 : index
    %138 = memref.load %arg2[%c6_52, %c1_53] : memref<8x4xf32, #tpu.memory_space<smem>>
    %139 = vector.extract_strided_slice %1 {offsets = [1, 0], sizes = [1, 256], strides = [1, 1]} : vector<4x256xf32> to vector<1x256xf32>
    %140 = vector.broadcast %138 : f32 to vector<1x256xf32>
    %141 = arith.mulf %140, %139 : vector<1x256xf32>
    %142 = arith.addf %137, %141 : vector<1x256xf32>
    %c6_54 = arith.constant 6 : index
    %c2_55 = arith.constant 2 : index
    %143 = memref.load %arg2[%c6_54, %c2_55] : memref<8x4xf32, #tpu.memory_space<smem>>
    %144 = vector.extract_strided_slice %1 {offsets = [2, 0], sizes = [1, 256], strides = [1, 1]} : vector<4x256xf32> to vector<1x256xf32>
    %145 = vector.broadcast %143 : f32 to vector<1x256xf32>
    %146 = arith.mulf %145, %144 : vector<1x256xf32>
    %147 = arith.addf %142, %146 : vector<1x256xf32>
    %c6_56 = arith.constant 6 : index
    %c3_57 = arith.constant 3 : index
    %148 = memref.load %arg2[%c6_56, %c3_57] : memref<8x4xf32, #tpu.memory_space<smem>>
    %149 = vector.extract_strided_slice %1 {offsets = [3, 0], sizes = [1, 256], strides = [1, 1]} : vector<4x256xf32> to vector<1x256xf32>
    %150 = vector.broadcast %148 : f32 to vector<1x256xf32>
    %151 = arith.mulf %150, %149 : vector<1x256xf32>
    %152 = arith.addf %147, %151 : vector<1x256xf32>
    %c6_58 = arith.constant 6 : index
    %153 = memref.load %arg3[%c6_58] : memref<8xf32, #tpu.memory_space<smem>>
    %154 = vector.broadcast %153 : f32 to vector<1x256xf32>
    %155 = arith.addf %152, %154 : vector<1x256xf32>
    %c7 = arith.constant 7 : index
    %c0_59 = arith.constant 0 : index
    %156 = memref.load %arg2[%c7, %c0_59] : memref<8x4xf32, #tpu.memory_space<smem>>
    %157 = vector.extract_strided_slice %1 {offsets = [0, 0], sizes = [1, 256], strides = [1, 1]} : vector<4x256xf32> to vector<1x256xf32>
    %158 = vector.broadcast %156 : f32 to vector<1x256xf32>
    %159 = arith.mulf %158, %157 : vector<1x256xf32>
    %c7_60 = arith.constant 7 : index
    %c1_61 = arith.constant 1 : index
    %160 = memref.load %arg2[%c7_60, %c1_61] : memref<8x4xf32, #tpu.memory_space<smem>>
    %161 = vector.extract_strided_slice %1 {offsets = [1, 0], sizes = [1, 256], strides = [1, 1]} : vector<4x256xf32> to vector<1x256xf32>
    %162 = vector.broadcast %160 : f32 to vector<1x256xf32>
    %163 = arith.mulf %162, %161 : vector<1x256xf32>
    %164 = arith.addf %159, %163 : vector<1x256xf32>
    %c7_62 = arith.constant 7 : index
    %c2_63 = arith.constant 2 : index
    %165 = memref.load %arg2[%c7_62, %c2_63] : memref<8x4xf32, #tpu.memory_space<smem>>
    %166 = vector.extract_strided_slice %1 {offsets = [2, 0], sizes = [1, 256], strides = [1, 1]} : vector<4x256xf32> to vector<1x256xf32>
    %167 = vector.broadcast %165 : f32 to vector<1x256xf32>
    %168 = arith.mulf %167, %166 : vector<1x256xf32>
    %169 = arith.addf %164, %168 : vector<1x256xf32>
    %c7_64 = arith.constant 7 : index
    %c3_65 = arith.constant 3 : index
    %170 = memref.load %arg2[%c7_64, %c3_65] : memref<8x4xf32, #tpu.memory_space<smem>>
    %171 = vector.extract_strided_slice %1 {offsets = [3, 0], sizes = [1, 256], strides = [1, 1]} : vector<4x256xf32> to vector<1x256xf32>
    %172 = vector.broadcast %170 : f32 to vector<1x256xf32>
    %173 = arith.mulf %172, %171 : vector<1x256xf32>
    %174 = arith.addf %169, %173 : vector<1x256xf32>
    %c7_66 = arith.constant 7 : index
    %175 = memref.load %arg3[%c7_66] : memref<8xf32, #tpu.memory_space<smem>>
    %176 = vector.broadcast %175 : f32 to vector<1x256xf32>
    %177 = arith.addf %174, %176 : vector<1x256xf32>
    %178 = tpu.concatenate %23, %45, %67, %89, %111, %133, %155, %177 in 0 : vector<1x256xf32>, vector<1x256xf32>, vector<1x256xf32>, vector<1x256xf32>, vector<1x256xf32>, vector<1x256xf32>, vector<1x256xf32>, vector<1x256xf32> -> vector<8x256xf32>
    %cst = arith.constant 0.000000e+00 : f32
    %179 = vector.broadcast %cst : f32 to vector<8x256xf32>
    %180 = arith.cmpf oge, %178, %179 : vector<8x256xf32>
    %cst_67 = arith.constant 0.00999999977 : f32
    %181 = vector.broadcast %cst_67 : f32 to vector<8x256xf32>
    %182 = arith.mulf %181, %178 : vector<8x256xf32>
    %183 = arith.select %180, %178, %182 : vector<8x256xi1>, vector<8x256xf32>
    %c0_68 = arith.constant 0 : index
    %c0_69 = arith.constant 0 : index
    %c0_70 = arith.constant 0 : index
    %184 = vector.load %arg5[%c0_68, %c0_69, %c0_70] : memref<1x8x256xf32, #tpu.memory_space<vmem>>, vector<1x8x256xf32>
    %185 = vector.shape_cast %184 : vector<1x8x256xf32> to vector<8x256xf32>
    %186 = vector.shape_cast %183 : vector<8x256xf32> to vector<1x8x256xf32>
    tpu.vector_store %arg5[%c0_68, %c0_69, %c0_70], %186 {strides = array<i32>} : memref<1x8x256xf32, #tpu.memory_space<vmem>>, vector<1x8x256xf32>,
    return
  }
  func.func @transform_0(%arg0: i32, %arg1: i32) -> (i32, i32) {
    %c0_i32 = arith.constant 0 : i32
    %c0_i32_0 = arith.constant 0 : i32
    %c0_i32_1 = arith.constant 0 : i32
    return %c0_i32, %c0_i32_0 : i32, i32
  }
  func.func @transform_1(%arg0: i32, %arg1: i32) -> i32 {
    %c0_i32 = arith.constant 0 : i32
    %c0_i32_0 = arith.constant 0 : i32
    return %c0_i32 : i32
  }
  func.func @transform_2(%arg0: i32, %arg1: i32) -> (i32, i32, i32) {
    %c0_i32 = arith.constant 0 : i32
    %c0_i32_0 = arith.constant 0 : i32
    return %arg0, %c0_i32, %arg1 : i32, i32, i32
  }
  func.func @transform_3(%arg0: i32, %arg1: i32) -> (i32, i32, i32) {
    %c0_i32 = arith.constant 0 : i32
    %c0_i32_0 = arith.constant 0 : i32
    return %arg0, %c0_i32, %arg1 : i32, i32, i32
  }
}

</mosaic_0001>

<bundles_post_ra>
// kernel: tpu_custom_call.1
= control target key start
LH: loop header
LB: loop body
LE: loop exit
PB: predicated region body
PF: predicated region fallthrough
CT: control target
= control target key end

     0   :  { %8 = vsyncpa [#allocation4], 0  ;;  %s1333_s0 = inlined_call_operand.vmem [shape: f32[8,4], index: 0, kind: input, shape index: {}]   ;;  %s1334_s1 = inlined_call_operand.vmem [shape: f32[8], index: 1, kind: input, shape index: {}]   ;;  %s1335_s2 = inlined_call_operand.vmem [shape: f32[2,4,256], index: 2, kind: input, shape index: {}]   ;;  %s1336_s3 = inlined_call_operand.hbm [shape: f32[2,8,256], index: 3, kind: output, shape index: {}]  }
   0x1   :  { %9 = vsyncpa [#allocation6], 0 }
   0x2   :  { %10 = vsyncpa [#allocation3], 0 }
   0x3   :  { %12 = vsyncpa [#allocation3 + $0x1], 0  ;;  %s998_s12 = smov 0   ;;  %s1000_s13 = smov 0  }
   0x4   :  { %s1002_s14 = smov 0   ;;  %s1004_s15 = smov 0  }
   0x5   :  { %s1006_s16 = smov 0   ;;  %s1008_s17 = smov 0  }
   0x6 LB: > { %s700_s18 = sadd.s32 4294967295, %s973_s17   ;;  %s701_s19 = sadd.s32 4294967294, %s973_s17   ;;  %s973_s17 = sphi %s1008_s17, %s18_s17   ;;  %s969_s16 = sphi %s1006_s16, %s1354_s16   ;;  %s965_s15 = sphi %s1004_s15, %s1353_s15   ;;  %s961_s14 = sphi %s1002_s14, %s1352_s14   ;;  %s957_s13 = sphi %s1000_s13, %s1351_s13   ;;  %s953_s12 = sphi %s998_s12, %s1350_s12  }
   0x7   : > { %s30_s20 = sadd.s32 1, %s969_s16  ;;  %s109_s21 = sadd.s32 1, %s961_s14 }
   0x8   : > { %p32_p0 = scmp.ge.s32.totalorder %s30_s20, 2  ;;  %p119_p1 = scmp.ne.s32.totalorder %s961_s14, %s957_s13 }
   0x9   : > { %p120_p2 = scmp.eq.s32.totalorder %s700_s18, 1  ;;  %p125_p3 = scmp.ne.s32.totalorder %s957_s13, %s953_s12 }
   0xa   : > { %s1356_s20 = smov (%p32_p0, %s30_s20), 0  ;;  %p126_p5 = scmp.eq.s32.totalorder %s701_s19, 1 }
   0xb   : > { %p1038_p4 = por %p120_p2, %p119_p1  ;;  %s104_s23 = ssub.s32 %s969_s16, %s1356_s20 }
   0xc   : > { %p702_p6 = scmp.ge.s32.totalorder %s973_s17, 1  ;;  %p107_p7 = scmp.eq.s32.totalorder %s104_s23, 0 }
   0xd   : > { %s1341_s22 = scalar_select %p1038_p4, 1, 0 }
   0xe   : > { %p1045_p8 = por %p126_p5, %p125_p3  ;;  %p133_p9 = scmp.lt.s32.totalorder %s973_s17, 3 }
   0xf   : > { %s1051_s25 = scalar_select %p107_p7, %s961_s14, %s109_s21  }
  0x10   : > { %s1342_s24 = scalar_select %p1045_p8, 1, 0 }
  0x11   : > { %p1053_p10 = pnand %p702_p6, %p133_p9  ;;  %p1057_p11 = scmp.eq.s32.totalorder %s700_s18, 0 }
  0x12   : > { %s146_s30 = sshll.u32 %s1333_s0, 4  ;;  %s157_s6 = sshll.u32 %s1334_s1, 4  ;;  %s147_s30 = int_to_ptr.vmem [resolvable:$true] %s146_s30  ;;  %s158_s6 = int_to_ptr.vmem [resolvable:$true] %s157_s6 }
  0x13   : > { %s1343_s26 = scalar_select %p1053_p10, 1, 0 }
  0x14   : > { %s1344_s27 = scalar_select %p1057_p11, 1, 0 }
  0x15   : > { %p791_p12 = pneg %p1053_p10  ;;  %s857_s8 = scalar_lea.vmem %s147_s30, 128 }
  0x16   : > { %p858_p0 = scmp.ne.s32.totalorder %s147_s30, %s857_s8  ;;  %p865_p5 = scmp.lt.s32.totalorder %s147_s30, %s147_s30 }
  0x17   : > { %p1071_p13 = pnand %p1057_p11, %p791_p12  ;;  %p866_p6 = scmp.lt.s32.totalorder %s857_s8, %s857_s8 }
  0x19   : > { %p859_p1 = pneg %p1071_p13  ;;  %p867_p7 = por %p866_p6, %p865_p5 }
  0x1b   : > { %p860_p2 = pnand %p859_p1, %p858_p0 }
  0x1d   : > { %p861_p3 = pneg %p860_p2 }
  0x1f   : > { %p868_p9 = pnand %p867_p7, %p861_p3 }
  0x21   : > { %871 = shalt.err (!%p868_p9)
}
  0x22   : > { %s975_s9 = smov [#allocation2]   ;;  %s872_s10 = scalar_lea.vmem %s158_s6, 16 }
  0x23   : > { %794 = dma.vmem_to_smem (!%p1071_p13), %s147_s30, 128, %s975_s9, [#allocation4]  }
  0x24   : > { %p873_p12 = scmp.ne.s32.totalorder %s158_s6, %s872_s10  ;;  %p880_p11 = scmp.lt.s32.totalorder %s158_s6, %s158_s6 }
  0x25   : > { %p881_p10 = scmp.lt.s32.totalorder %s872_s10, %s872_s10 }
  0x26   : > { %p875_p8 = pnand %p873_p12, %p859_p1 }
  0x27   : > { %p882_p0 = por %p881_p10, %p880_p11 }
  0x28   : > { %p876_p4 = pneg %p875_p8 }
  0x2a   : > { %p883_p2 = pnand %p882_p0, %p876_p4 }
  0x2c   : > { %886 = shalt.err (!%p883_p2)
}
  0x2d   : > { %s976_s11 = smov [#allocation5]   ;;  %p1346_p3 = scmp.ne.s32.totalorder %s1343_s26, 0 }
  0x2e   : > { %797 = dma.vmem_to_smem (!%p1071_p13), %s158_s6, 16, %s976_s11, [#allocation6]  }
  0x2f   : > { %183 = sbr.rel (%p1346_p3) target bundleno = 126 (0x7e), region = 32  ;;  %p1347_p5 = scmp.ne.s32.totalorder (!%p1346_p3), %s1344_s27, 0 }
  0x36   : > { %940 = dma.done.wait (%p1347_p5), [#allocation4], 128  }
  0x37   : > { %942 = vsyncadd (%p1347_p5), [#allocation4], 4294967168 }
  0x38   : > { %944 = dma.done.wait (%p1347_p5), [#allocation6], 16  }
  0x39   : > { %946 = vsyncadd (%p1347_p5), [#allocation6], 4294967280 }
  0x3a   : > { %193 = sfence }
  0x3b   : > { %p217_p4 = scmp.lt.s32.totalorder %s965_s15, 1  ;;  %s228_s18 = sld [smem:[#allocation2]]  ;;  %v469_v0 = vlaneseq  ;;  %vm556_vm0 = vcmask 1040384   ;;  %vm559_vm1 = vcmask 1041408   ;;  %vm562_vm2 = vcmask 1042432  }
  0x3c   : > { %s712_s19 = sld [smem:[#allocation2 + $0x1]]  ;;  %s714_s23 = sld [smem:[#allocation2 + $0x2]]  ;;  %vm565_vm3 = vcmask 1043456   ;;  %vm568_vm4 = vcmask 1044480   ;;  %vm571_vm5 = vcmask 1045504   ;;  %vm574_vm6 = vcmask 1046528  }
  0x3d   : > { %s218_s21 = scalar_select %p217_p4, %s965_s15, 1  ;;  %v470_v4 = vshrl.u32 %v469_v0, 7 }
  0x3e   : > { %s716_s26 = sld [smem:[#allocation2 + $0x3]]  ;;  %s1093_s29 = sld [smem:[#allocation5]] }
  0x3f   : > { %s779_s28 = sshll.u32 %s218_s21, 3  ;;  %s718_s6 = sld [smem:[#allocation2 + $0x80]]  ;;  %v1124_v13 = vsub.s32 0, %v470_v4  ;;  %v1126_v14 = vsub.s32 4, %v470_v4 }
  0x40   : > { %s224_s5 = scalar_lea.vmem %s1335_s2, %s779_s28  ;;  %s1100_s27 = sld [smem:[#allocation2 + $0x81]] }
  0x41   : > { %v1098_v1 = vld [vmem:[%s224_s5] sm:$0xff]  ;;  %v229_v2 = vstv %s228_s18  ;;  %s1102_s7 = sld [smem:[#allocation2 + $0x82]]  ;;  %s1104_s8 = sld [smem:[#allocation2 + $0x83]] }
  0x42   : > { %v232_v3 = vstv %s712_s19  ;;  %s1106_s9 = sld [smem:[#allocation5 + $0x1]]  ;;  %v230_v5 = vmul.f32 %v229_v2, %v1098_v1  ;;  %s1110_s10 = sld [smem:[#allocation2 + $0x100]]  ;;  %v240_v7 = vstv %s714_s23 }
  0x43   : > { %v233_v6 = vmul.f32 %v232_v3, %v1098_v1  ;;  %s1112_s11 = sld [smem:[#allocation2 + $0x101]]  ;;  %s1114_s18 = sld [smem:[#allocation2 + $0x102]]  ;;  %v241_v10 = vmul.f32 %v240_v7, %v1098_v1 }
  0x44   : > { %v248_v8 = vstv %s716_s26  ;;  %s1116_s21 = sld [smem:[#allocation2 + $0x103]]  ;;  %s1120_s19 = sld [smem:[#allocation2 + $0x180]]  ;;  %v256_v31 = vstv %s1093_s29 }
  0x45   : > { %v713_v9 = vrot.slane %v233_v6, 9  ;;  %v249_v11 = vmul.f32 %v248_v8, %v1098_v1  ;;  %v259_v12 = vstv %s718_s6  ;;  %s1122_s28 = sld [smem:[#allocation2 + $0x181]]  ;;  %v715_v16 = vrot.slane %v241_v10, 10  ;;  %s1128_s23 = sld [smem:[#allocation2 + $0x182]] }
  0x46   : > { %s1130_s26 = sld [smem:[#allocation2 + $0x183]]  ;;  %v260_v18 = vmul.f32 %v259_v12, %v1098_v1  ;;  %v262_v19 = vstv %s1100_s27  ;;  %s1136_s30 = sld [smem:[#allocation5 + $0x2]] }
  0x47   : > { %v238_v15 = vadd.f32 %v713_v9, %v230_v5  ;;  %v717_v17 = vrot.slane %v249_v11, 11  ;;  %v270_v20 = vstv %s1102_s7  ;;  %v278_v21 = vstv %s1104_s8  ;;  %s1141_s4 = sld [smem:[#allocation2 + $0x200]]  ;;  %s1143_s5 = sld [smem:[#allocation2 + $0x201]] }
  0x48   : > { %v263_v23 = vmul.f32 %v262_v19, %v1098_v1  ;;  %v271_v24 = vmul.f32 %v270_v20, %v1098_v1  ;;  %v279_v25 = vmul.f32 %v278_v21, %v1098_v1  ;;  %v289_v26 = vstv %s1110_s10  ;;  %s1150_s6 = sld [smem:[#allocation5 + $0x3]]  ;;  %s1152_s27 = sld [smem:[#allocation2 + $0x202]] }
  0x49   : > { %v246_v22 = vadd.f32 %v715_v16, %v238_v15  ;;  %v292_v27 = vstv %s1112_s11  ;;  %v300_v28 = vstv %s1114_s18  ;;  %v286_v34 = vstv %s1106_s9  ;;  %s1158_s7 = sld [smem:[#allocation2 + $0x203]]  ;;  %s1162_s29 = sld [smem:[#allocation2 + $0x280]] }
  0x4a   : > { %v308_v29 = vstv %s1116_s21  ;;  %v720_v32 = vrot.slane %v263_v23, 9  ;;  %v722_v33 = vrot.slane %v271_v24, 10  ;;  %v290_v35 = vmul.f32 %v289_v26, %v1098_v1  ;;  %s1167_s8 = sld [smem:[#allocation5 + $0x4]]  ;;  %s1172_s9 = sld [smem:[#allocation2 + $0x281]] }
  0x4b   : > { %v254_v30 = vadd.f32 %v717_v17, %v246_v22  ;;  %v293_v36 = vmul.f32 %v292_v27, %v1098_v1  ;;  %v301_v37 = vmul.f32 %v300_v28, %v1098_v1  ;;  %v724_v39 = vrot.slane %v279_v25, 11  ;;  %s1174_s10 = sld [smem:[#allocation2 + $0x282]]  ;;  %s1179_s11 = sld [smem:[#allocation2 + $0x283]] }
  0x4c   : > { %v268_v38 = vadd.f32 %v720_v32, %v260_v18  ;;  %v309_v40 = vmul.f32 %v308_v29, %v1098_v1  ;;  %v319_v41 = vstv %s1120_s19  ;;  %v322_v47 = vstv %s1122_s28  ;;  %s1184_s18 = sld [smem:[#allocation2 + $0x300]]  ;;  %s1186_s21 = sld [smem:[#allocation5 + $0x5]] }
  0x4d   : > { %v1164_v42 = vadd.f32 %v256_v31, %v254_v30  ;;  %v728_v43 = vrot.slane %v293_v36, 9  ;;  %v730_v44 = vrot.slane %v301_v37, 10  ;;  %v320_v45 = vmul.f32 %v319_v41, %v1098_v1  ;;  %s1192_s19 = sld [smem:[#allocation2 + $0x301]]  ;;  %s1194_s28 = sld [smem:[#allocation2 + $0x302]] }
  0x4e   : > { %v276_v46 = vadd.f32 %v722_v33, %v268_v38  ;;  %v330_v48 = vstv %s1128_s23  ;;  %v338_v49 = vstv %s1130_s26  ;;  %v323_v51 = vmul.f32 %v322_v47, %v1098_v1  ;;  %s1198_s23 = sld [smem:[#allocation2 + $0x303]]  ;;  %s1204_s26 = sld [smem:[#allocation2 + $0x380]] }
  0x4f   : > { %v298_v50 = vadd.f32 %v728_v43, %v290_v35  ;;  %v331_v52 = vmul.f32 %v330_v48, %v1098_v1  ;;  %v339_v53 = vmul.f32 %v338_v49, %v1098_v1  ;;  %v316_v55 = vstv %s1136_s30  ;;  %s1207_s30 = sld [smem:[#allocation2 + $0x381]]  ;;  %p1348_p10 = scmp.ne.s32.totalorder %s1341_s22, 0 }
  0x50   : > { %v284_v54 = vadd.f32 %v724_v39, %v276_v46  ;;  %v349_v56 = vstv %s1141_s4  ;;  %v352_v57 = vstv %s1143_s5  ;;  %v732_v59 = vrot.slane %v309_v40, 11  ;;  %s1212_s4 = sld [smem:[#allocation2 + $0x382]]  ;;  %s1214_s5 = sld [smem:[#allocation2 + $0x383]] }
  0x51   : > { %v306_v58 = vadd.f32 %v730_v44, %v298_v50  ;;  %v736_v60 = vrot.slane %v323_v51, 9  ;;  %v738_v61 = vrot.slane %v331_v52, 10  ;;  %v346_v62 = vstv %s1150_s6  ;;  %s1221_s6 = sld [smem:[#allocation5 + $0x6]] }
  0x52   : > { %v350_v63 = vmul.f32 %v349_v56, %v1098_v1  ;;  %v353_v0 = vmul.f32 %v352_v57, %v1098_v1  ;;  %v360_v2 = vstv %s1152_s27  ;;  %v740_v4 = vrot.slane %v339_v53, 11  ;;  %s1234_s27 = sld [smem:[#allocation5 + $0x7]] }
  0x53   : > { %v328_v3 = vadd.f32 %v736_v60, %v320_v45  ;;  %v361_v5 = vmul.f32 %v360_v2, %v1098_v1  ;;  %v368_v6 = vstv %s1158_s7  ;;  %v1200_v7 = vadd.f32 %v286_v34, %v284_v54  ;;  %s213_s7 = sand.u32 1, %s957_s13  }
  0x54   : > { %v744_v8 = vrot.slane %v353_v0, 9  ;;  %v369_v9 = vmul.f32 %v368_v6, %v1098_v1  ;;  %v379_v10 = vstv %s1162_s29  ;;  %v314_v11 = vadd.f32 %v732_v59, %v306_v58  ;;  %s709_s29 = sshll.u32 %s213_s7, 4 }
  0x55   : > { %v336_v12 = vadd.f32 %v738_v61, %v328_v3  ;;  %v746_v15 = vrot.slane %v361_v5, 10  ;;  %v376_v16 = vstv %s1167_s8  ;;  %v380_v18 = vmul.f32 %v379_v10, %v1098_v1  ;;  %s780_s8 = sshll.u32 %s965_s15, 8  ;;  %s586_s15 = scalar_lea.sflag [#allocation3], %s213_s7 }
  0x56   : > { %v358_v17 = vadd.f32 %v744_v8, %v350_v63  ;;  %v382_v19 = vstv %s1172_s9  ;;  %v390_v20 = vstv %s1174_s10  ;;  %v748_v21 = vrot.slane %v369_v9, 11  ;;  %s215_s9 = scalar_lea.vmem [#allocation7], %s709_s29 }
  0x57   : > { %v383_v22 = vmul.f32 %v382_v19, %v1098_v1  ;;  %v391_v23 = vmul.f32 %v390_v20, %v1098_v1  ;;  %v398_v24 = vstv %s1179_s11  ;;  %v344_v25 = vadd.f32 %v740_v4, %v336_v12  ;;  %s602_s10 = sshll.u32 %s215_s9, 4  ;;  %s1286_s10 = int_to_ptr.vmem [resolvable:$true] %s602_s10 }
  0x58   : > { %v366_v26 = vadd.f32 %v746_v15, %v358_v17  ;;  %v399_v27 = vmul.f32 %v398_v24, %v1098_v1  ;;  %v409_v28 = vstv %s1184_s18  ;;  %v1223_v29 = vadd.f32 %v316_v55, %v314_v11 }
  0x59   : > { %v752_v30 = vrot.slane %v383_v22, 9  ;;  %v754_v31 = vrot.slane %v391_v23, 10  ;;  %v406_v32 = vstv %s1186_s21  ;;  %v410_v34 = vmul.f32 %v409_v28, %v1098_v1  ;;  %s1284_s21 = scalar_lea.hbm %s1336_s3, %s780_s8 }
  0x5a   : > { %v756_v33 = vrot.slane %v399_v27, 11  ;;  %v412_v35 = vstv %s1192_s19  ;;  %v420_v36 = vstv %s1194_s28  ;;  %v428_v40 = vstv %s1198_s23  ;;  %s887_s19 = scalar_lea.vmem %s1286_s10, 256  ;;  %s977_s28 = smov [#allocation7]  }
  0x5b   : > { %v388_v37 = vadd.f32 %v752_v30, %v380_v18  ;;  %v413_v38 = vmul.f32 %v412_v35, %v1098_v1  ;;  %v421_v39 = vmul.f32 %v420_v36, %v1098_v1  ;;  %v347_v41 = vadd.f32 %v346_v62, %v344_v25  ;;  %p888_p8 = scmp.ne.s32.totalorder %s1286_s10, %s887_s19  ;;  %s891_s23 = sshll.u32 %s977_s28, 4  ;;  %s892_s23 = int_to_ptr.vmem [resolvable:$false] %s891_s23 }
  0x5c   : > { %v374_v43 = vadd.f32 %v748_v21, %v366_v26  ;;  %v429_v44 = vmul.f32 %v428_v40, %v1098_v1  ;;  %v439_v45 = vstv %s1204_s26  ;;  %v442_v51 = vstv %s1207_s30  ;;  %s893_s26 = scalar_lea.vmem %s892_s23, 512  ;;  %p894_p1 = scmp.lt.s32.totalorder %s1286_s10, %s892_s23 }
  0x5d   : > { %v396_v46 = vadd.f32 %v754_v31, %v388_v37  ;;  %v760_v47 = vrot.slane %v413_v38, 9  ;;  %v762_v48 = vrot.slane %v421_v39, 10  ;;  %v440_v49 = vmul.f32 %v439_v45, %v1098_v1  ;;  %p889_p11 = pnand %p888_p8, %p1348_p10  ;;  %p895_p6 = scmp.lt.s32.totalorder %s893_s26, %s887_s19 }
  0x5e   : > { %v764_v50 = vrot.slane %v429_v44, 11  ;;  %v450_v52 = vstv %s1212_s4  ;;  %v458_v53 = vstv %s1214_s5  ;;  %v443_v56 = vmul.f32 %v442_v51, %v1098_v1 }
  0x5f   : > { %v404_v54 = vadd.f32 %v756_v33, %v396_v46  ;;  %v418_v55 = vadd.f32 %v760_v47, %v410_v34  ;;  %v451_v57 = vmul.f32 %v450_v52, %v1098_v1  ;;  %v377_v58 = vadd.f32 %v376_v16, %v374_v43  ;;  %p890_p13 = pneg %p889_p11  ;;  %p896_p7 = por %p895_p6, %p894_p1 }
  0x60   : > { %v436_v59 = vstv %s1221_s6  ;;  %v459_v60 = vmul.f32 %v458_v53, %v1098_v1  ;;  %v472_v61 = vrot.slane %v1164_v42, %v1124_v13  ;;  %v768_v63 = vrot.slane %v443_v56, 9 }
  0x61   : > { %v426_v62 = vadd.f32 %v762_v48, %v418_v55  ;;  %v770_v0 = vrot.slane %v451_v57, 10  ;;  %v476_v2 = vrot.slane %v1164_v42, %v1126_v14  ;;  %v407_v3 = vadd.f32 %v406_v32, %v404_v54  ;;  %p897_p9 = pnand %p896_p7, %p890_p13 }
  0x62   : > { %v483_v4 = vrot.slane %v1200_v7, %v1124_v13  ;;  %v487_v5 = vrot.slane %v1200_v7, %v1126_v14  ;;  %v494_v1 = vrot.slane %v1223_v29, %v1124_v13  ;;  %v448_v8 = vadd.f32 %v768_v63, %v440_v49 }
  0x63   : > { %v434_v6 = vadd.f32 %v764_v50, %v426_v62  ;;  %v772_v9 = vrot.slane %v459_v60, 11  ;;  %v498_v10 = vrot.slane %v1223_v29, %v1126_v14  ;;  %v466_v11 = vstv %s1234_s27 }
  0x64   : > { %v505_v42 = vrot.slane %v347_v41, %v1124_v13  ;;  %v509_v12 = vrot.slane %v347_v41, %v1126_v14  ;;  %v516_v15 = vrot.slane %v377_v58, %v1124_v13  ;;  %v456_v17 = vadd.f32 %v770_v0, %v448_v8 }
  0x65   : > { %v437_v16 = vadd.f32 %v436_v59, %v434_v6  ;;  %v520_v7 = vrot.slane %v377_v58, %v1126_v14  ;;  %v557_v18 = vsel %vm556_vm0, %v472_v61, %v483_v4  ;;  %v527_v19 = vrot.slane %v407_v3, %v1124_v13 }
  0x66   : > { %v531_v20 = vrot.slane %v407_v3, %v1126_v14  ;;  %v558_v21 = vsel %vm556_vm0, %v476_v2, %v487_v5  ;;  %v560_v22 = vsel %vm559_vm1, %v557_v18, %v494_v1  ;;  %v464_v23 = vadd.f32 %v772_v9, %v456_v17 }
  0x67   : > { %v538_v24 = vrot.slane %v437_v16, %v1124_v13  ;;  %v542_v25 = vrot.slane %v437_v16, %v1126_v14  ;;  %v561_v26 = vsel %vm559_vm1, %v558_v21, %v498_v10  ;;  %v563_v27 = vsel %vm562_vm2, %v560_v22, %v505_v42 }
  0x68   : > { %v564_v28 = vsel %vm562_vm2, %v561_v26, %v509_v12  ;;  %v467_v29 = vadd.f32 %v466_v11, %v464_v23  ;;  %v566_v30 = vsel %vm565_vm3, %v563_v27, %v516_v15 }
  0x69   : > { %v567_v31 = vsel %vm565_vm3, %v564_v28, %v520_v7  ;;  %v569_v32 = vsel %vm568_vm4, %v566_v30, %v527_v19 }
  0x6a   : > { %v570_v33 = vsel %vm568_vm4, %v567_v31, %v531_v20  ;;  %v549_v34 = vrot.slane %v467_v29, %v1124_v13  ;;  %v553_v35 = vrot.slane %v467_v29, %v1126_v14  ;;  %v572_v36 = vsel %vm571_vm5, %v569_v32, %v538_v24 }
  0x6b   : > { %v573_v37 = vsel %vm571_vm5, %v570_v33, %v542_v25 }
  0x6c   : > { %v575_v38 = vsel %vm574_vm6, %v572_v36, %v549_v34  ;;  %v576_v39 = vsel %vm574_vm6, %v573_v37, %v553_v35 }
  0x6d   : > { %vm577_vm7 = vcmp.ge.f32.partialorder %v575_v38, 0.0  ;;  %vm578_vm8 = vcmp.ge.f32.partialorder %v576_v39, 0.0  ;;  %v579_v40 = vmul.f32 0.01, %v575_v38  ;;  %v580_v41 = vmul.f32 0.01, %v576_v39 }
  0x6f   : > { %v581_v13 = vsel %vm577_vm7, %v575_v38, %v579_v40  ;;  %v582_v14 = vsel %vm578_vm8, %v576_v39, %v580_v41 }
  0x70   : > { %583 = vst [vmem:[%s215_s9] sm:$0xff] %v581_v13  ;;  %584 = vst [vmem:[%s215_s9 + $0x8] sm:$0xff] %v582_v14 }
  0x71   : > { %900 = shalt.err (!%p897_p9)
}
  0x72   : > { %s901_s30 = scalar_lea.hbm %s1284_s21, 256  ;;  %s905_s6 = scalar_lea.hbm %s1336_s3, 512 }
  0x73   : > { %p902_p12 = scmp.ne.s32.totalorder %s1284_s21, %s901_s30  ;;  %p906_p3 = scmp.lt.u32.totalorder %s1284_s21, %s1336_s3 }
  0x74   : > { %p907_p5 = scmp.lt.u32.totalorder %s905_s6, %s901_s30  ;;  %p909_p8 = scmp.lt.u32.totalorder %s901_s30, %s1284_s21 }
  0x75   : > { %p903_p0 = pnand %p902_p12, %p1348_p10 }
  0x76   : > { %p908_p4 = por %p907_p5, %p906_p3 }
  0x77   : > { %p904_p2 = pneg %p903_p0 }
  0x78   : > { %p910_p11 = por %p909_p8, %p908_p4 }
  0x7a   : > { %p911_p13 = pnand %p910_p11, %p904_p2 }
  0x7c   : > { %914 = shalt.err (!%p911_p13)
}
  0x7d   : > { %789 = dma.vmem_to_hbm [thread:$0]  (%p1348_p10), %s1286_s10, 256, %s1284_s21, %s586_s15  }
  0x7e PF: > { %p806_p1 = scmp.ge.s32.totalorder %s973_s17, 2  ;;  %s614_s29 = sand.u32 1, %s953_s12  }
  0x7f   : > { %p1349_p6 = scmp.ne.s32.totalorder %s1342_s24, 0  ;;  %s615_s8 = scalar_lea.sflag [#allocation3], %s614_s29 }
  0x81   : > { %p799_p7 = pnand %p806_p1, %p1349_p6 }
  0x83   : > { %948 = dma.done.wait (!%p799_p7), %s615_s8, 256  }
  0x84   : > { %950 = vsyncadd (!%p799_p7), %s615_s8, 4294967040  ;;  %s18_s17 = sadd.s32 1, %s973_s17   ;;  %s1350_s12 = smov %s957_s13 }
  0x85   : > { %p15_p9 = scmp.ge.s32.totalorder %s18_s17, 4   ;;  %s1351_s13 = smov %s961_s14 }
  0x86   : > { %s1352_s14 = smov %s1051_s25  ;;  %s1353_s15 = smov %s969_s16 }
  0x87   : > { %s1354_s16 = smov %s1356_s20  ;;  %17 = sbr.rel (!%p15_p9) target bundleno = 6 (0x6), region = 76 }
  0x8e   :  { %620 = vsyncpa [#allocation3], 1 }
  0x8f   :  { %622 = vsyncpa [#allocation3 + $0x1], 1 }
  0x90   :  { %623 = vsyncpa [#allocation4], 1 }
  0x91   :  { %625 = vsyncpa [#allocation4 + $0x1], 1 }
  0x92   :  { %626 = vsyncpa [#allocation6], 1 }

</bundles_post_ra>
